<compile_context>
chip_gen: v6e
topology: v6e:2x2x1
jax: 0.10.0
libtpu: 0.0.40
codegen_flags: <defaults>
</compile_context>

<pallas_src>
import functools

import jax
import jax.numpy as jnp
from jax import lax
from jax.experimental import pallas as pl
from jax.experimental.pallas import tpu as pltpu


def _mha_flash_kernel(qres_ref, qp_ref, kp_ref, vp_ref,
                      wl_ref, bl_ref, gamma_ref, beta_ref,
                      o_ref,
                      m_scr, l_scr, acc_scr,
                      *, n_head, d_model, s_kv, eps, mxu_dtype,
                      approx_recip, bf16_exp, mask_kv):
    ki = pl.program_id(2)
    nkv = pl.num_programs(2)

    tq = qp_ref.shape[2]
    tkv = kp_ref.shape[2]

    # ---- init (first KV tile of this (batch, q-tile)): reset online-softmax stats.
    @pl.when(ki == 0)
    def _init():
        m_scr[...] = jnp.full(m_scr.shape, -jnp.inf, m_scr.dtype)
        l_scr[...] = jnp.zeros(l_scr.shape, l_scr.dtype)
        acc_scr[...] = jnp.zeros(acc_scr.shape, acc_scr.dtype)

    # Mask for padded KV positions (only emitted when the sequence was padded).
    if mask_kv:
        col = lax.broadcasted_iota(jnp.int32, (tq, tkv), 1) + ki * tkv
        kv_valid = col < s_kv

    # ---- online-softmax (flash) update for this KV tile, per head.
    for h in range(n_head):                       # n_head is small & static
        q_h = qp_ref[0, h]                        # (tq,  d_q)  mxu dtype, pre-scaled
        k_h = kp_ref[0, h]                        # (tkv, d_k)
        v_h = vp_ref[0, h]                        # (tkv, d_v)
        # scores = q_h @ k_h^T, contracting last dims directly (no explicit .T relayout).
        s = lax.dot_general(q_h, k_h,
                            dimension_numbers=(((1,), (1,)), ((), ())),
                            preferred_element_type=jnp.float32)   # (tq, tkv) f32
        if mask_kv:
            s = jnp.where(kv_valid, s, -jnp.inf)
        m_prev = m_scr[h]                         # (tq, 1) f32
        m_new = jnp.maximum(m_prev, jnp.max(s, axis=-1, keepdims=True))
        alpha = jnp.exp(m_prev - m_new)
        if bf16_exp:
            # Opt-in (v6e/v7x): exp on the bf16 EUP; stats stay f32.
            p = jnp.exp((s - m_new).astype(jnp.bfloat16))
            l_scr[h] = alpha * l_scr[h] + jnp.sum(p.astype(jnp.float32),
                                                  axis=-1, keepdims=True)
            p_mm = p
        else:
            p = jnp.exp(s - m_new)                # f32
            l_scr[h] = alpha * l_scr[h] + jnp.sum(p, axis=-1, keepdims=True)
            p_mm = p.astype(mxu_dtype)
        acc_scr[h] = alpha * acc_scr[h] + jnp.dot(
            p_mm, v_h, preferred_element_type=jnp.float32)
        m_scr[h] = m_new

    # ---- finalize: normalize, output projection (per-head accumulate == concat GEMM),
    #      residual add, LayerNorm over the true d_model columns.
    @pl.when(ki == nkv - 1)
    def _finalize():
        out = None
        for h in range(n_head):
            inv_l = pl.reciprocal(l_scr[h], approx=approx_recip)   # (tq, 1)
            ctx = (acc_scr[h] * inv_l).astype(mxu_dtype)            # (tq, d_v)
            part = jnp.dot(ctx, wl_ref[h], preferred_element_type=jnp.float32)
            out = part if out is None else out + part
        x = out + bl_ref[...] + qres_ref[0]        # (tq, d_model_p) f32; pad lanes == 0
        inv_d = 1.0 / float(d_model)
        mean = jnp.sum(x, axis=-1, keepdims=True) * inv_d
        xc = x - mean
        if x.shape[-1] != d_model:                 # lane-padded: mask pad columns
            lane = lax.broadcasted_iota(jnp.int32, x.shape, 1)
            sq = jnp.where(lane < d_model, xc * xc, 0.0)
        else:
            sq = xc * xc
        var = jnp.sum(sq, axis=-1, keepdims=True) * inv_d
        y = xc * lax.rsqrt(var + eps)
        o_ref[0] = (y * gamma_ref[...] + beta_ref[...]).astype(o_ref.dtype)


def _round_up(x, m):
    return ((x + m - 1) // m) * m


def _choose_tile(S, target):
    """Tile size: min(target, S) rounded to sublane (8) granularity; ragged tails
    are handled by pad+mask, so no full-S fallback is needed."""
    target = max(8, (int(target) // 8) * 8)
    if S >= target:
        return target
    return _round_up(S, 8)


def _device_kind():
    try:
        return jax.devices()[0].device_kind.lower()
    except Exception:
        return ""


def multi_head_att(Q, K, V, params, *, n_head=1, d_q=64, d_k=64, d_v=64,
                   eps=1e-5, mxu_dtype=jnp.bfloat16,
                   tq_target=None, tkv_target=None,
                   bf16_exp=False, vmem_limit_bytes=None):
    """Pallas TPU implementation of MultiHeadATT.forward(Q, K, V)."""
    f32 = jnp.float32
    B, S_q, d_model = Q.shape
    Bk, S_kv, _ = K.shape
    assert Bk == B and V.shape == K.shape

    approx_recip = bool(mxu_dtype != jnp.float32)
    bf16_exp = bool(bf16_exp) and (mxu_dtype == jnp.bfloat16)

    # Device-aware budgets: v7x has 64 MiB physical VMEM / 2 TCs; v5e/v6e have 128 MiB.
    kind = _device_kind()
    is_v7 = "v7" in kind
    if vmem_limit_bytes is None:
        vmem_limit_bytes = (48 if is_v7 else 64) * 1024 * 1024
    if tq_target is None:
        tq_target = 256
    if tkv_target is None:
        tkv_target = 256 if is_v7 else 512

    # Reference quirk (scaleDotproductAtt): scale = 1/sqrt(len(q[0])) = 1/sqrt(n_head),
    # NOT 1/sqrt(d_q).  Applied exactly once here, folded into the projected Q.
    scale = 1.0 / (float(n_head) ** 0.5)

    # --- fused wide projections (one GEMM each, all heads at once), done by XLA ---
    wq = params["wq"].astype(f32); bq = params["bq"].astype(f32)
    wk = params["wk"].astype(f32); bk = params["bk"].astype(f32)
    wv = params["wv"].astype(f32); bv = params["bv"].astype(f32)
    qp = (jnp.dot(Q.astype(f32), wq) + bq) * scale      # (B, Sq,  n_head*d_q)
    kp = jnp.dot(K.astype(f32), wk) + bk                # (B, Skv, n_head*d_k)
    vp = jnp.dot(V.astype(f32), wv) + bv                # (B, Skv, n_head*d_v)
    # Per-head layout + pre-cast to MXU dtype (halves the re-streamed K/V HBM bytes).
    qp = qp.reshape(B, S_q, n_head, d_q).transpose(0, 2, 1, 3).astype(mxu_dtype)
    kp = kp.reshape(B, S_kv, n_head, d_k).transpose(0, 2, 1, 3).astype(mxu_dtype)
    vp = vp.reshape(B, S_kv, n_head, d_v).transpose(0, 2, 1, 3).astype(mxu_dtype)

    # --- tiles + sequence padding (ragged tails handled by pad + -inf KV mask) ---
    tq = _choose_tile(S_q, tq_target)
    tkv = _choose_tile(S_kv, tkv_target)
    S_q_pad = _round_up(S_q, tq)
    S_kv_pad = _round_up(S_kv, tkv)
    nq = S_q_pad // tq
    nkv = S_kv_pad // tkv
    mask_kv = S_kv_pad != S_kv

    if S_q_pad != S_q:
        qp = jnp.pad(qp, ((0, 0), (0, 0), (0, S_q_pad - S_q), (0, 0)))
    if mask_kv:
        kp = jnp.pad(kp, ((0, 0), (0, 0), (0, S_kv_pad - S_kv), (0, 0)))
        vp = jnp.pad(vp, ((0, 0), (0, 0), (0, S_kv_pad - S_kv), (0, 0)))

    # --- lane-dense output: zero-pad d_model to a multiple of 128 (padded x-columns
    #     stay exactly 0, so LN statistics over the true d_model columns are exact) ---
    d_model_p = _round_up(d_model, 128)
    pad_c = d_model_p - d_model
    q_res = Q.astype(f32)
    if S_q_pad != S_q or pad_c:
        q_res = jnp.pad(q_res, ((0, 0), (0, S_q_pad - S_q), (0, pad_c)))
    wl = params["wl"].reshape(n_head, d_v, d_model).astype(mxu_dtype)
    bl = params["bl"].reshape(1, d_model).astype(f32)
    gamma = params["gamma"].reshape(1, d_model).astype(f32)
    beta = params["beta"].reshape(1, d_model).astype(f32)
    if pad_c:
        wl = jnp.pad(wl, ((0, 0), (0, 0), (0, pad_c)))
        bl = jnp.pad(bl, ((0, 0), (0, pad_c)))
        gamma = jnp.pad(gamma, ((0, 0), (0, pad_c)))
        beta = jnp.pad(beta, ((0, 0), (0, pad_c)))

    qres_spec = pl.BlockSpec((1, tq, d_model_p), lambda b, qi, ki: (b, qi, 0))
    qp_spec = pl.BlockSpec((1, n_head, tq, d_q), lambda b, qi, ki: (b, 0, qi, 0))
    kp_spec = pl.BlockSpec((1, n_head, tkv, d_k), lambda b, qi, ki: (b, 0, ki, 0))
    vp_spec = pl.BlockSpec((1, n_head, tkv, d_v), lambda b, qi, ki: (b, 0, ki, 0))
    out_spec = pl.BlockSpec((1, tq, d_model_p), lambda b, qi, ki: (b, qi, 0))

    def full_spec(a):
        nd = a.ndim
        return pl.BlockSpec(a.shape, lambda b, qi, ki, _nd=nd: (0,) * _nd)

    kernel = functools.partial(
        _mha_flash_kernel, n_head=n_head, d_model=d_model, s_kv=S_kv, eps=eps,
        mxu_dtype=mxu_dtype, approx_recip=approx_recip, bf16_exp=bf16_exp,
        mask_kv=mask_kv)

    out_padded = pl.pallas_call(
        kernel,
        out_shape=jax.ShapeDtypeStruct((B, S_q_pad, d_model_p), f32),
        grid_spec=pltpu.PrefetchScalarGridSpec(
            num_scalar_prefetch=0,
            grid=(B, nq, nkv),
            in_specs=[qres_spec, qp_spec, kp_spec, vp_spec,
                      full_spec(wl), full_spec(bl),
                      full_spec(gamma), full_spec(beta)],
            out_specs=out_spec,
            scratch_shapes=[
                pltpu.VMEM((n_head, tq, 1), f32),    # running row max
                pltpu.VMEM((n_head, tq, 1), f32),    # running denominator
                pltpu.VMEM((n_head, tq, d_v), f32),  # running context accumulator
            ]),
        compiler_params=pltpu.CompilerParams(
            dimension_semantics=("parallel", "parallel", "arbitrary"),
            vmem_limit_bytes=vmem_limit_bytes),
    )(q_res, qp, kp, vp, wl, bl, gamma, beta)

    if S_q_pad != S_q or pad_c:
        out_padded = out_padded[:, :S_q, :d_model]
    return out_padded


def _reference(Q, K, V, p, *, n_head, d_q, d_k, d_v, eps=1e-5):
    """Pure-JAX replica of the PyTorch forward for validation."""
    B, Sq, _ = Q.shape
    Skv = K.shape[1]
    Kp = (K @ p["wk"] + p["bk"]).reshape(B, Skv, n_head, d_k).transpose(0, 2, 1, 3)
    Qp = (Q @ p["wq"] + p["bq"]).reshape(B, Sq, n_head, d_q).transpose(0, 2, 1, 3)
    Vp = (V @ p["wv"] + p["bv"]).reshape(B, Skv, n_head, d_v).transpose(0, 2, 1, 3)
    scores = jnp.einsum("bhsd,bhtd->bhst", Qp, Kp) / (n_head ** 0.5)  # reference quirk
    attn = jax.nn.softmax(scores, axis=-1)
    ctx = jnp.einsum("bhst,bhtd->bhsd", attn, Vp)
    ctx = ctx.transpose(0, 2, 1, 3).reshape(B, Sq, n_head * d_v)
    out = ctx @ p["wl"] + p["bl"]
    x = out + Q
    mean = x.mean(-1, keepdims=True)
    var = ((x - mean) ** 2).mean(-1, keepdims=True)
    return (x - mean) / jnp.sqrt(var + eps) * p["gamma"] + p["beta"]


def _make_params(key, d_model, n_head, d_q, d_k, d_v):
    ks = jax.random.split(key, 8)
    return {
        "wq": 0.1 * jax.random.normal(ks[0], (d_model, d_q * n_head), jnp.float32),
        "bq": 0.1 * jax.random.normal(ks[1], (d_q * n_head,), jnp.float32),
        "wk": 0.1 * jax.random.normal(ks[2], (d_model, d_k * n_head), jnp.float32),
        "bk": 0.1 * jax.random.normal(ks[3], (d_k * n_head,), jnp.float32),
        "wv": 0.1 * jax.random.normal(ks[4], (d_model, d_v * n_head), jnp.float32),
        "bv": 0.1 * jax.random.normal(ks[5], (d_v * n_head,), jnp.float32),
        "wl": 0.1 * jax.random.normal(ks[6], (d_v * n_head, d_model), jnp.float32),
        "bl": 0.1 * jax.random.normal(ks[7], (d_model,), jnp.float32),
        "gamma": jnp.ones((d_model,), jnp.float32),
        "beta": jnp.zeros((d_model,), jnp.float32),
    }


if __name__ == "__main__":
    key = jax.random.PRNGKey(0)
    d_q = d_k = d_v = 64

    # A: module defaults (n_head=1), single tile.
    # B: 2 heads, forced 8-wide tiles -> exercises the multi-tile online-softmax path.
    # C: ragged S (12 -> padded to 16) -> exercises seq padding + -inf KV masking.
    configs = [
        dict(name="A", B=2, S=8, d_model=32, n_head=1, tq=None, tkv=None),
        dict(name="B", B=2, S=16, d_model=32, n_head=2, tq=8, tkv=8),
        dict(name="C", B=1, S=12, d_model=32, n_head=2, tq=8, tkv=8),
    ]

    for i, cfg in enumerate(configs):
        B, S, d_model, n_head = cfg["B"], cfg["S"], cfg["d_model"], cfg["n_head"]
        kpar, kq, kk, kv = jax.random.split(jax.random.fold_in(key, i), 4)
        params = _make_params(kpar, d_model, n_head, d_q, d_k, d_v)
        Q = jax.random.normal(kq, (B, S, d_model), jnp.float32)
        K = jax.random.normal(kk, (B, S, d_model), jnp.float32)
        V = jax.random.normal(kv, (B, S, d_model), jnp.float32)

        ref = _reference(Q, K, V, params, n_head=n_head, d_q=d_q, d_k=d_k, d_v=d_v)

        # Exact f32 path (mxu_dtype=f32, exact reciprocal) — tight tolerance.
        out_f32 = multi_head_att(Q, K, V, params, n_head=n_head, d_q=d_q, d_k=d_k,
                                 d_v=d_v, mxu_dtype=jnp.float32,
                                 tq_target=cfg["tq"], tkv_target=cfg["tkv"])
        out_f32 = jax.block_until_ready(out_f32)
        assert out_f32.shape == ref.shape
        assert jnp.allclose(out_f32, ref, atol=1e-4, rtol=1e-4), (
            f"f32 mismatch (config {cfg['name']}): "
            f"{jnp.max(jnp.abs(out_f32 - ref))}")

        # Performance path: bf16 MXU operands, f32 softmax stats / accumulation / LN.
        out_bf16 = multi_head_att(Q, K, V, params, n_head=n_head, d_q=d_q, d_k=d_k,
                                  d_v=d_v, mxu_dtype=jnp.bfloat16,
                                  tq_target=cfg["tq"], tkv_target=cfg["tkv"])
        out_bf16 = jax.block_until_ready(out_bf16)
        assert out_bf16.shape == ref.shape
        assert jnp.allclose(out_bf16, ref, atol=5e-2, rtol=5e-2), (
            f"bf16 mismatch (config {cfg['name']}): "
            f"{jnp.max(jnp.abs(out_bf16 - ref))}")

    print("KERNEL_OK")
</pallas_src>

<mosaic_0001>
module attributes {stable_mosaic.version = 11 : i64} {
  func.func @_mha_flash_kernel(%arg0: i32, %arg1: i32, %arg2: i32, %arg3: memref<1x8x128xf32, #tpu.memory_space<vmem>>, %arg4: memref<1x1x8x64xf32, #tpu.memory_space<vmem>>, %arg5: memref<1x1x8x64xf32, #tpu.memory_space<vmem>>, %arg6: memref<1x1x8x64xf32, #tpu.memory_space<vmem>>, %arg7: memref<1x64x128xf32, #tpu.memory_space<vmem>>, %arg8: memref<1x128xf32, #tpu.memory_space<vmem>>, %arg9: memref<1x128xf32, #tpu.memory_space<vmem>>, %arg10: memref<1x128xf32, #tpu.memory_space<vmem>>, %arg11: memref<1x8x128xf32, #tpu.memory_space<vmem>>, %arg12: memref<1x8x1xf32, #tpu.memory_space<vmem>>, %arg13: memref<1x8x1xf32, #tpu.memory_space<vmem>>, %arg14: memref<1x8x64xf32, #tpu.memory_space<vmem>>) attributes {dimension_semantics = [#tpu.dimension_semantics<parallel>, #tpu.dimension_semantics<parallel>, #tpu.dimension_semantics<arbitrary>], iteration_bounds = array<i64: 2, 1, 1>, scalar_prefetch = 0 : i64, scratch_operands = 3 : i64, tpu.core_type = #tpu.core_type<tc>, window_params = [{transform_indices = @transform_0, window_bounds = array<i64: 1, 8, 128>}, {transform_indices = @transform_1, window_bounds = array<i64: 1, 1, 8, 64>}, {transform_indices = @transform_2, window_bounds = array<i64: 1, 1, 8, 64>}, {transform_indices = @transform_3, window_bounds = array<i64: 1, 1, 8, 64>}, {pipeline_mode = #tpu.pipeline_mode<synchronous>, transform_indices = @transform_4, window_bounds = array<i64: 1, 64, 128>}, {pipeline_mode = #tpu.pipeline_mode<synchronous>, transform_indices = @transform_5, window_bounds = array<i64: 1, 128>}, {pipeline_mode = #tpu.pipeline_mode<synchronous>, transform_indices = @transform_6, window_bounds = array<i64: 1, 128>}, {pipeline_mode = #tpu.pipeline_mode<synchronous>, transform_indices = @transform_7, window_bounds = array<i64: 1, 128>}, {transform_indices = @transform_8, window_bounds = array<i64: 1, 8, 128>}]} {
    %c0_i32 = arith.constant 0 : i32
    %0 = arith.cmpi eq, %arg2, %c0_i32 : i32
    %1 = arith.extui %0 : i1 to i32
    %c0_i32_0 = arith.constant 0 : i32
    %2 = arith.cmpi ne, %1, %c0_i32_0 : i32
    scf.if %2 {
      %cst_35 = arith.constant 0xFF800000 : f32
      %44 = vector.broadcast %cst_35 : f32 to vector<1x8x1xf32>
      %c0_36 = arith.constant 0 : index
      %c0_37 = arith.constant 0 : index
      %c0_38 = arith.constant 0 : index
      %45 = vector.load %arg12[%c0_36, %c0_37, %c0_38] : memref<1x8x1xf32, #tpu.memory_space<vmem>>, vector<1x8x1xf32>
      tpu.vector_store %arg12[%c0_36, %c0_37, %c0_38], %44 {strides = array<i32>} : memref<1x8x1xf32, #tpu.memory_space<vmem>>, vector<1x8x1xf32>,
      %cst_39 = arith.constant 0.000000e+00 : f32
      %46 = vector.broadcast %cst_39 : f32 to vector<1x8x1xf32>
      %c0_40 = arith.constant 0 : index
      %c0_41 = arith.constant 0 : index
      %c0_42 = arith.constant 0 : index
      %47 = vector.load %arg13[%c0_40, %c0_41, %c0_42] : memref<1x8x1xf32, #tpu.memory_space<vmem>>, vector<1x8x1xf32>
      tpu.vector_store %arg13[%c0_40, %c0_41, %c0_42], %46 {strides = array<i32>} : memref<1x8x1xf32, #tpu.memory_space<vmem>>, vector<1x8x1xf32>,
      %cst_43 = arith.constant 0.000000e+00 : f32
      %48 = vector.broadcast %cst_43 : f32 to vector<1x8x64xf32>
      %c0_44 = arith.constant 0 : index
      %c0_45 = arith.constant 0 : index
      %c0_46 = arith.constant 0 : index
      %49 = vector.load %arg14[%c0_44, %c0_45, %c0_46] : memref<1x8x64xf32, #tpu.memory_space<vmem>>, vector<1x8x64xf32>
      tpu.vector_store %arg14[%c0_44, %c0_45, %c0_46], %48 {strides = array<i32>} : memref<1x8x64xf32, #tpu.memory_space<vmem>>, vector<1x8x64xf32>,
    } else {
    }
    %c0 = arith.constant 0 : index
    %c0_1 = arith.constant 0 : index
    %c0_2 = arith.constant 0 : index
    %c0_3 = arith.constant 0 : index
    %3 = vector.load %arg4[%c0, %c0_1, %c0_2, %c0_3] : memref<1x1x8x64xf32, #tpu.memory_space<vmem>>, vector<1x1x8x64xf32>
    %4 = vector.shape_cast %3 : vector<1x1x8x64xf32> to vector<8x64xf32>
    %c0_4 = arith.constant 0 : index
    %c0_5 = arith.constant 0 : index
    %c0_6 = arith.constant 0 : index
    %c0_7 = arith.constant 0 : index
    %5 = vector.load %arg5[%c0_4, %c0_5, %c0_6, %c0_7] : memref<1x1x8x64xf32, #tpu.memory_space<vmem>>, vector<1x1x8x64xf32>
    %6 = vector.shape_cast %5 : vector<1x1x8x64xf32> to vector<8x64xf32>
    %c0_8 = arith.constant 0 : index
    %c0_9 = arith.constant 0 : index
    %c0_10 = arith.constant 0 : index
    %c0_11 = arith.constant 0 : index
    %7 = vector.load %arg6[%c0_8, %c0_9, %c0_10, %c0_11] : memref<1x1x8x64xf32, #tpu.memory_space<vmem>>, vector<1x1x8x64xf32>
    %8 = vector.shape_cast %7 : vector<1x1x8x64xf32> to vector<8x64xf32>
    %cst = arith.constant dense<0.000000e+00> : vector<8x8xf32>
    %9 = tpu.matmul %4, %6, %cst {dimension_numbers = #tpu.dot_dimension_numbers<[1], [1], [0], [0], [0, 0, 1, 0], [], []>} : vector<8x64xf32>, vector<8x64xf32>, vector<8x8xf32> -> vector<8x8xf32>
    %c0_12 = arith.constant 0 : index
    %c0_13 = arith.constant 0 : index
    %c0_14 = arith.constant 0 : index
    %10 = vector.load %arg12[%c0_12, %c0_13, %c0_14] : memref<1x8x1xf32, #tpu.memory_space<vmem>>, vector<1x8x1xf32>
    %11 = vector.shape_cast %10 : vector<1x8x1xf32> to vector<8x1xf32>
    %cst_15 = arith.constant dense<0xFF800000> : vector<8xf32>
    %12 = vector.multi_reduction <maximumf>, %9, %cst_15 [1] : vector<8x8xf32> to vector<8xf32>
    %13 = vector.shape_cast %12 : vector<8xf32> to vector<8x1xf32>
    %14 = arith.maximumf %11, %13 : vector<8x1xf32>
    %15 = arith.subf %11, %14 : vector<8x1xf32>
    %16 = math.exp %15 : vector<8x1xf32>
    %17 = vector.broadcast %14 : vector<8x1xf32> to vector<8x8xf32>
    %18 = arith.subf %9, %17 : vector<8x8xf32>
    %19 = math.exp %18 : vector<8x8xf32>
    %c0_16 = arith.constant 0 : index
    %c0_17 = arith.constant 0 : index
    %c0_18 = arith.constant 0 : index
    %20 = vector.load %arg13[%c0_16, %c0_17, %c0_18] : memref<1x8x1xf32, #tpu.memory_space<vmem>>, vector<1x8x1xf32>
    %21 = vector.shape_cast %20 : vector<1x8x1xf32> to vector<8x1xf32>
    %22 = arith.mulf %16, %21 : vector<8x1xf32>
    %cst_19 = arith.constant dense<0.000000e+00> : vector<8xf32>
    %23 = vector.multi_reduction <add>, %19, %cst_19 [1] : vector<8x8xf32> to vector<8xf32>
    %24 = vector.shape_cast %23 : vector<8xf32> to vector<8x1xf32>
    %25 = arith.addf %22, %24 : vector<8x1xf32>
    %c0_20 = arith.constant 0 : index
    %c0_21 = arith.constant 0 : index
    %c0_22 = arith.constant 0 : index
    %26 = vector.load %arg13[%c0_20, %c0_21, %c0_22] : memref<1x8x1xf32, #tpu.memory_space<vmem>>, vector<1x8x1xf32>
    %27 = vector.shape_cast %26 : vector<1x8x1xf32> to vector<8x1xf32>
    %28 = vector.shape_cast %25 : vector<8x1xf32> to vector<1x8x1xf32>
    tpu.vector_store %arg13[%c0_20, %c0_21, %c0_22], %28 {strides = array<i32>} : memref<1x8x1xf32, #tpu.memory_space<vmem>>, vector<1x8x1xf32>,
    %c0_23 = arith.constant 0 : index
    %c0_24 = arith.constant 0 : index
    %c0_25 = arith.constant 0 : index
    %29 = vector.load %arg14[%c0_23, %c0_24, %c0_25] : memref<1x8x64xf32, #tpu.memory_space<vmem>>, vector<1x8x64xf32>
    %30 = vector.shape_cast %29 : vector<1x8x64xf32> to vector<8x64xf32>
    %31 = vector.broadcast %16 : vector<8x1xf32> to vector<8x64xf32>
    %32 = arith.mulf %31, %30 : vector<8x64xf32>
    %cst_26 = arith.constant dense<0.000000e+00> : vector<8x64xf32>
    %33 = tpu.matmul %19, %8, %cst_26 {dimension_numbers = #tpu.dot_dimension_numbers<[1], [0], [0], [1], [0, 0, 1, 1], [], []>} : vector<8x8xf32>, vector<8x64xf32>, vector<8x64xf32> -> vector<8x64xf32>
    %34 = arith.addf %32, %33 : vector<8x64xf32>
    %c0_27 = arith.constant 0 : index
    %c0_28 = arith.constant 0 : index
    %c0_29 = arith.constant 0 : index
    %35 = vector.load %arg14[%c0_27, %c0_28, %c0_29] : memref<1x8x64xf32, #tpu.memory_space<vmem>>, vector<1x8x64xf32>
    %36 = vector.shape_cast %35 : vector<1x8x64xf32> to vector<8x64xf32>
    %37 = vector.shape_cast %34 : vector<8x64xf32> to vector<1x8x64xf32>
    tpu.vector_store %arg14[%c0_27, %c0_28, %c0_29], %37 {strides = array<i32>} : memref<1x8x64xf32, #tpu.memory_space<vmem>>, vector<1x8x64xf32>,
    %c0_30 = arith.constant 0 : index
    %c0_31 = arith.constant 0 : index
    %c0_32 = arith.constant 0 : index
    %38 = vector.load %arg12[%c0_30, %c0_31, %c0_32] : memref<1x8x1xf32, #tpu.memory_space<vmem>>, vector<1x8x1xf32>
    %39 = vector.shape_cast %38 : vector<1x8x1xf32> to vector<8x1xf32>
    %40 = vector.shape_cast %14 : vector<8x1xf32> to vector<1x8x1xf32>
    tpu.vector_store %arg12[%c0_30, %c0_31, %c0_32], %40 {strides = array<i32>} : memref<1x8x1xf32, #tpu.memory_space<vmem>>, vector<1x8x1xf32>,
    %c0_i32_33 = arith.constant 0 : i32
    %41 = arith.cmpi eq, %arg2, %c0_i32_33 : i32
    %42 = arith.extui %41 : i1 to i32
    %c0_i32_34 = arith.constant 0 : i32
    %43 = arith.cmpi ne, %42, %c0_i32_34 : i32
    scf.if %43 {
      %c0_35 = arith.constant 0 : index
      %c0_36 = arith.constant 0 : index
      %c0_37 = arith.constant 0 : index
      %44 = vector.load %arg13[%c0_35, %c0_36, %c0_37] : memref<1x8x1xf32, #tpu.memory_space<vmem>>, vector<1x8x1xf32>
      %45 = vector.shape_cast %44 : vector<1x8x1xf32> to vector<8x1xf32>
      %46 = tpu.reciprocal %45 : vector<8x1xf32> -> vector<8x1xf32>
      %c0_38 = arith.constant 0 : index
      %c0_39 = arith.constant 0 : index
      %c0_40 = arith.constant 0 : index
      %47 = vector.load %arg14[%c0_38, %c0_39, %c0_40] : memref<1x8x64xf32, #tpu.memory_space<vmem>>, vector<1x8x64xf32>
      %48 = vector.shape_cast %47 : vector<1x8x64xf32> to vector<8x64xf32>
      %49 = vector.broadcast %46 : vector<8x1xf32> to vector<8x64xf32>
      %50 = arith.mulf %48, %49 : vector<8x64xf32>
      %c0_41 = arith.constant 0 : index
      %c0_42 = arith.constant 0 : index
      %c0_43 = arith.constant 0 : index
      %51 = vector.load %arg7[%c0_41, %c0_42, %c0_43] : memref<1x64x128xf32, #tpu.memory_space<vmem>>, vector<1x64x128xf32>
      %52 = vector.shape_cast %51 : vector<1x64x128xf32> to vector<64x128xf32>
      %cst_44 = arith.constant dense<0.000000e+00> : vector<8x128xf32>
      %53 = tpu.matmul %50, %52, %cst_44 {dimension_numbers = #tpu.dot_dimension_numbers<[1], [0], [0], [1], [0, 0, 1, 1], [], []>} : vector<8x64xf32>, vector<64x128xf32>, vector<8x128xf32> -> vector<8x128xf32>
      %c0_45 = arith.constant 0 : index
      %c0_46 = arith.constant 0 : index
      %54 = vector.load %arg8[%c0_45, %c0_46] : memref<1x128xf32, #tpu.memory_space<vmem>>, vector<1x128xf32>
      %55 = vector.broadcast %54 : vector<1x128xf32> to vector<8x128xf32>
      %56 = arith.addf %53, %55 : vector<8x128xf32>
      %c0_47 = arith.constant 0 : index
      %c0_48 = arith.constant 0 : index
      %c0_49 = arith.constant 0 : index
      %57 = vector.load %arg3[%c0_47, %c0_48, %c0_49] : memref<1x8x128xf32, #tpu.memory_space<vmem>>, vector<1x8x128xf32>
      %58 = vector.shape_cast %57 : vector<1x8x128xf32> to vector<8x128xf32>
      %59 = arith.addf %56, %58 : vector<8x128xf32>
      %cst_50 = arith.constant dense<0.000000e+00> : vector<8xf32>
      %60 = vector.multi_reduction <add>, %59, %cst_50 [1] : vector<8x128xf32> to vector<8xf32>
      %61 = vector.shape_cast %60 : vector<8xf32> to vector<8x1xf32>
      %cst_51 = arith.constant 3.125000e-02 : f32
      %62 = vector.broadcast %cst_51 : f32 to vector<8x1xf32>
      %63 = arith.mulf %61, %62 : vector<8x1xf32>
      %64 = vector.broadcast %63 : vector<8x1xf32> to vector<8x128xf32>
      %65 = arith.subf %59, %64 : vector<8x128xf32>
      %66 = tpu.iota {dimensions = array<i32: 1>} : vector<8x128xi32>
      %c32_i32 = arith.constant 32 : i32
      %67 = vector.broadcast %c32_i32 : i32 to vector<8x128xi32>
      %68 = arith.cmpi slt, %66, %67 : vector<8x128xi32>
      %69 = arith.mulf %65, %65 : vector<8x128xf32>
      %cst_52 = arith.constant 0.000000e+00 : f32
      %70 = vector.broadcast %cst_52 : f32 to vector<8x128xf32>
      %71 = arith.select %68, %69, %70 : vector<8x128xi1>, vector<8x128xf32>
      %cst_53 = arith.constant dense<0.000000e+00> : vector<8xf32>
      %72 = vector.multi_reduction <add>, %71, %cst_53 [1] : vector<8x128xf32> to vector<8xf32>
      %73 = vector.shape_cast %72 : vector<8xf32> to vector<8x1xf32>
      %cst_54 = arith.constant 3.125000e-02 : f32
      %74 = vector.broadcast %cst_54 : f32 to vector<8x1xf32>
      %75 = arith.mulf %73, %74 : vector<8x1xf32>
      %cst_55 = arith.constant 9.99999974E-6 : f32
      %76 = vector.broadcast %cst_55 : f32 to vector<8x1xf32>
      %77 = arith.addf %75, %76 : vector<8x1xf32>
      %78 = math.rsqrt %77 : vector<8x1xf32>
      %79 = vector.broadcast %78 : vector<8x1xf32> to vector<8x128xf32>
      %80 = arith.mulf %65, %79 : vector<8x128xf32>
      %c0_56 = arith.constant 0 : index
      %c0_57 = arith.constant 0 : index
      %81 = vector.load %arg9[%c0_56, %c0_57] : memref<1x128xf32, #tpu.memory_space<vmem>>, vector<1x128xf32>
      %82 = vector.broadcast %81 : vector<1x128xf32> to vector<8x128xf32>
      %83 = arith.mulf %80, %82 : vector<8x128xf32>
      %c0_58 = arith.constant 0 : index
      %c0_59 = arith.constant 0 : index
      %84 = vector.load %arg10[%c0_58, %c0_59] : memref<1x128xf32, #tpu.memory_space<vmem>>, vector<1x128xf32>
      %85 = vector.broadcast %84 : vector<1x128xf32> to vector<8x128xf32>
      %86 = arith.addf %83, %85 : vector<8x128xf32>
      %c0_60 = arith.constant 0 : index
      %c0_61 = arith.constant 0 : index
      %c0_62 = arith.constant 0 : index
      %87 = vector.load %arg11[%c0_60, %c0_61, %c0_62] : memref<1x8x128xf32, #tpu.memory_space<vmem>>, vector<1x8x128xf32>
      %88 = vector.shape_cast %87 : vector<1x8x128xf32> to vector<8x128xf32>
      %89 = vector.shape_cast %86 : vector<8x128xf32> to vector<1x8x128xf32>
      tpu.vector_store %arg11[%c0_60, %c0_61, %c0_62], %89 {strides = array<i32>} : memref<1x8x128xf32, #tpu.memory_space<vmem>>, vector<1x8x128xf32>,
    } else {
    }
    return
  }
  func.func @transform_0(%arg0: i32, %arg1: i32, %arg2: i32) -> (i32, i32, i32) {
    %c0_i32 = arith.constant 0 : i32
    %c0_i32_0 = arith.constant 0 : i32
    return %arg0, %arg1, %c0_i32 : i32, i32, i32
  }
  func.func @transform_1(%arg0: i32, %arg1: i32, %arg2: i32) -> (i32, i32, i32, i32) {
    %c0_i32 = arith.constant 0 : i32
    %c0_i32_0 = arith.constant 0 : i32
    %c0_i32_1 = arith.constant 0 : i32
    return %arg0, %c0_i32, %arg1, %c0_i32_0 : i32, i32, i32, i32
  }
  func.func @transform_2(%arg0: i32, %arg1: i32, %arg2: i32) -> (i32, i32, i32, i32) {
    %c0_i32 = arith.constant 0 : i32
    %c0_i32_0 = arith.constant 0 : i32
    %c0_i32_1 = arith.constant 0 : i32
    return %arg0, %c0_i32, %arg2, %c0_i32_0 : i32, i32, i32, i32
  }
  func.func @transform_3(%arg0: i32, %arg1: i32, %arg2: i32) -> (i32, i32, i32, i32) {
    %c0_i32 = arith.constant 0 : i32
    %c0_i32_0 = arith.constant 0 : i32
    %c0_i32_1 = arith.constant 0 : i32
    return %arg0, %c0_i32, %arg2, %c0_i32_0 : i32, i32, i32, i32
  }
  func.func @transform_4(%arg0: i32, %arg1: i32, %arg2: i32) -> (i32, i32, i32) {
    %c0_i32 = arith.constant 0 : i32
    %c0_i32_0 = arith.constant 0 : i32
    %c0_i32_1 = arith.constant 0 : i32
    %c0_i32_2 = arith.constant 0 : i32
    return %c0_i32, %c0_i32_0, %c0_i32_1 : i32, i32, i32
  }
  func.func @transform_5(%arg0: i32, %arg1: i32, %arg2: i32) -> (i32, i32) {
    %c0_i32 = arith.constant 0 : i32
    %c0_i32_0 = arith.constant 0 : i32
    %c0_i32_1 = arith.constant 0 : i32
    return %c0_i32, %c0_i32_0 : i32, i32
  }
  func.func @transform_6(%arg0: i32, %arg1: i32, %arg2: i32) -> (i32, i32) {
    %c0_i32 = arith.constant 0 : i32
    %c0_i32_0 = arith.constant 0 : i32
    %c0_i32_1 = arith.constant 0 : i32
    return %c0_i32, %c0_i32_0 : i32, i32
  }
  func.func @transform_7(%arg0: i32, %arg1: i32, %arg2: i32) -> (i32, i32) {
    %c0_i32 = arith.constant 0 : i32
    %c0_i32_0 = arith.constant 0 : i32
    %c0_i32_1 = arith.constant 0 : i32
    return %c0_i32, %c0_i32_0 : i32, i32
  }
  func.func @transform_8(%arg0: i32, %arg1: i32, %arg2: i32) -> (i32, i32, i32) {
    %c0_i32 = arith.constant 0 : i32
    %c0_i32_0 = arith.constant 0 : i32
    return %arg0, %arg1, %c0_i32 : i32, i32, i32
  }
}

</mosaic_0001>

<bundles_post_ra>
// kernel: tpu_custom_call.1
= control target key start
LH: loop header
LB: loop body
LE: loop exit
PB: predicated region body
PF: predicated region fallthrough
CT: control target
= control target key end

     0   :  { %s1724_s0 = inlined_call_operand.hbm [shape: f32[2,8,128], index: 0, kind: input, shape index: {}]   ;;  %s1725_s1 = inlined_call_operand.hbm [shape: f32[2,1,8,64], index: 1, kind: input, shape index: {}]   ;;  %s1726_s2 = inlined_call_operand.hbm [shape: f32[2,1,8,64], index: 2, kind: input, shape index: {}]   ;;  %s1727_s3 = inlined_call_operand.hbm [shape: f32[2,1,8,64], index: 3, kind: input, shape index: {}]   ;;  %s1728_s4 = inlined_call_operand.hbm [shape: f32[1,64,128], index: 4, kind: input, shape index: {}]   ;;  %s1729_s5 = inlined_call_operand.vmem [shape: f32[1,128], index: 5, kind: input, shape index: {}]   ;;  %s1730_s6 = inlined_call_operand.vmem [shape: f32[1,128], index: 6, kind: input, shape index: {}]   ;;  %s1731_s7 = inlined_call_operand.vmem [shape: f32[1,128], index: 7, kind: input, shape index: {}]   ;;  %s1732_s8 = inlined_call_operand.hbm [shape: f32[2,8,128], index: 8, kind: output, shape index: {}]  }
   0x1   :  { %1740 = sst [smem:[#allocation25_spill]] %s1725_s1 }
   0x2   :  { %1741 = sst [smem:[#allocation26_spill]] %s1728_s4 }
   0x3   :  { %1742 = sst [smem:[#allocation27_spill]] %s1732_s8 }
   0x4   :  { %13 = vsyncpa [#allocation6], 0 }
   0x5   :  { %15 = vsyncpa [#allocation6 + $0x1], 0 }
   0x6   :  { %16 = vsyncpa [#allocation9], 0 }
   0x7   :  { %18 = vsyncpa [#allocation9 + $0x1], 0 }
   0x8   :  { %19 = vsyncpa [#allocation12], 0 }
   0x9   :  { %21 = vsyncpa [#allocation12 + $0x1], 0 }
   0xa   :  { %22 = vsyncpa [#allocation7], 0 }
   0xb   :  { %24 = vsyncpa [#allocation7 + $0x1], 0  ;;  %s1449_s27 = smov 0   ;;  %s1451_s28 = smov 0  }
   0xc   :  { %s1453_s29 = smov 0   ;;  %s1455_s30 = smov 0  }
   0xd   :  { %s1457_s9 = smov 0   ;;  %s1459_s10 = smov 0  }
   0xe LB: > { %1743 = sst [smem:[#allocation20_spill]] %s1370_s27  ;;  %s1480_s11 = sadd.s32 4294967295, %s1390_s10   ;;  %s1390_s10 = sphi %s1459_s10, %s30_s10   ;;  %s1386_s9 = sphi %s1457_s9, %s1765_s9   ;;  %s1382_s30 = sphi %s1455_s30, %s1764_s30   ;;  %s1378_s29 = sphi %s1453_s29, %s1768_s29   ;;  %s1374_s28 = sphi %s1451_s28, %s1767_s28   ;;  %s1370_s27 = sphi %s1449_s27, %s1766_s27  }
   0xf   : > { %1744 = sst [smem:[#allocation21_spill]] %s1386_s9  ;;  %s984_s12 = sadd.s32 4294967294, %s1390_s10  }
  0x10   : > { %p71_p0 = scmp.ne.s32.totalorder %s1374_s28, %s1370_s27  ;;  %p72_p1 = scmp.eq.s32.totalorder %s1480_s11, 0 }
  0x11   : > { %p271_p3 = scmp.eq.s32.totalorder %s984_s12, 1  ;;  %p985_p5 = scmp.ge.s32.totalorder %s1390_s10, 1 }
  0x12   : > { %p1489_p4 = por %p72_p1, %p71_p0  ;;  %p278_p7 = scmp.lt.s32.totalorder %s1390_s10, 3 }
  0x13   : > { %p1494_p6 = por %p271_p3, %p71_p0  ;;  %s1392_s16 = smov [#allocation13]  }
  0x14   : > { %p1499_p8 = pnand %p985_p5, %p278_p7  ;;  %s290_s17 = sshll.u32 %s1392_s16, 4  ;;  %s291_s17 = int_to_ptr.vmem [resolvable:$true] %s290_s17 }
  0x15   : > { %s1746_s14 = scalar_select %p1494_p6, 1, 0 }
  0x16   : > { %p1070_p9 = pneg %p1499_p8  ;;  %p987_p10 = scmp.ge.s32.totalorder %s1390_s10, 2 }
  0x17   : > { %1747 = sst [smem:[#allocation22_spill]] %s1746_s14  ;;  %s49_s19 = sadd.s32 1, %s1386_s9 }
  0x18   : > { %p1508_p11 = pnand %p1070_p9, %p72_p1  ;;  %s1171_s20 = scalar_lea.vmem %s291_s17, 1024 }
  0x19   : > { %p1172_p13 = scmp.ne.s32.totalorder %s291_s17, %s1171_s20  ;;  %p1179_p5 = scmp.lt.s32.totalorder %s291_s17, %s291_s17 }
  0x1a   : > { %p1162_p12 = pneg %p1508_p11  ;;  %p1180_p7 = scmp.lt.s32.totalorder %s1171_s20, %s1171_s20 }
  0x1c   : > { %p1174_p0 = pnand %p1172_p13, %p1162_p12  ;;  %p1181_p2 = por %p1180_p7, %p1179_p5 }
  0x1e   : > { %p1175_p3 = pneg %p1174_p0 }
  0x20   : > { %p1182_p6 = pnand %p1181_p2, %p1175_p3 }
  0x22   : > { %1185 = shalt.err (!%p1182_p6)
}
  0x23   : > { %s1393_s21 = smov 128   ;;  %s1394_s22 = smov 8  }
  0x24   : > { %s1750_s4 = sld [smem:[#allocation26_spill]]  ;;  %p51_p2 = scmp.ge.s32.totalorder %s49_s19, 2 }
  0x25   : > { %s58_s25 = sadd.s32 1, %s1378_s29  ;;  %p65_p6 = scmp.ne.s32.totalorder %s1378_s29, %s1374_s28 }
  0x26   : > { %p66_p9 = scmp.eq.s32.totalorder %s1390_s10, 0  ;;  %s1770_s19 = smov (%p51_p2, %s49_s19), 0 }
  0x27   : > { %1751 = sst [smem:[#allocation23_spill]] %s1770_s19  ;;  %p1752_p13 = scmp.eq.s32.totalorder %s1480_s11, 1 }
  0x28   : > { %p67_p12 = por %p66_p9, %p65_p6  ;;  %s53_s12 = ssub.s32 %s1386_s9, %s1770_s19 }
  0x29   : > { %p1528_p0 = por %p1752_p13, %p65_p6  ;;  %p1092_p3 = scmp.lt.s32.totalorder %s1390_s10, 2 }
  0x2a   : > { %1073 = dma.hbm_to_vmem [thread:$0]  (!%p1508_p11), %s1750_s4, 1024, %s291_s17, [#allocation12], %s1393_s21, %s1393_s21, %s1394_s22  }
  0x2b   : > { %p56_p5 = scmp.eq.s32.totalorder %s53_s12, 0  ;;  %s1733_s16 = sand.u32 1, %s1378_s29  }
  0x2c   : > { %s1538_s17 = sshll.u32 %s1733_s16, 3  ;;  %s1541_s18 = sshll.u32 %s1386_s9, 7 }
  0x2d   : > { %s1544_s20 = scalar_select %p56_p5, %s1378_s29, %s58_s25  }
  0x2e   : > { %p1546_p11 = pnand %p1092_p3, %p67_p12  ;;  %s1737_s22 = sand.u32 1, %s1390_s10  }
  0x2f   : > { %1754 = sst [smem:[#allocation24_spill]] %s1544_s20  ;;  %s336_s4 = scalar_lea.vmem [#allocation8], %s1538_s17 }
  0x30   : > { %s1756_s1 = sld [smem:[#allocation25_spill]]  ;;  %s344_s16 = sshll.u32 %s336_s4, 4  ;;  %s345_s16 = int_to_ptr.vmem [resolvable:$true] %s344_s16 }
  0x31   : > { %s1558_s19 = scalar_lea.sflag [#allocation9], %s1737_s22  ;;  %p1188_p7 = pneg %p1546_p11 }
  0x32   : > { %s1199_s25 = scalar_lea.vmem %s345_s16, 128  ;;  %s1395_s9 = smov [#allocation8]  }
  0x33   : > { %p1200_p2 = scmp.ne.s32.totalorder %s345_s16, %s1199_s25  ;;  %s1204_s20 = sshll.u32 %s1395_s9, 4  ;;  %s1205_s20 = int_to_ptr.vmem [resolvable:$false] %s1204_s20 }
  0x34   : > { %s1206_s14 = scalar_lea.vmem %s1205_s20, 256  ;;  %p1207_p12 = scmp.lt.s32.totalorder %s345_s16, %s1205_s20 }
  0x35   : > { %p1202_p6 = pnand %p1200_p2, %p1188_p7  ;;  %p1208_p13 = scmp.lt.s32.totalorder %s1206_s14, %s1199_s25 }
  0x36   : > { %s342_s12 = scalar_lea.hbm %s1756_s1, %s1541_s18 }
  0x37   : > { %p1203_p9 = pneg %p1202_p6  ;;  %p1209_p3 = por %p1208_p13, %p1207_p12 }
  0x39   : > { %p1210_p5 = pnand %p1209_p3, %p1203_p9 }
  0x3b   : > { %1213 = shalt.err (!%p1210_p5)
}
  0x3c   : > { %1080 = dma.hbm_to_vmem [thread:$0]  (!%p1546_p11), %s342_s12, 128, %s345_s16, %s1558_s19  }
  0x3d   : > { %s323_s9 = scalar_lea.hbm %s1724_s0, %s1541_s18  ;;  %s317_s24 = scalar_lea.vmem [#allocation5], %s1538_s17 }
  0x3e   : > { %s325_s22 = sshll.u32 %s317_s24, 4  ;;  %s361_s25 = scalar_lea.hbm %s1726_s2, %s1541_s18  ;;  %s326_s22 = int_to_ptr.vmem [resolvable:$true] %s325_s22 }
  0x3f   : > { %s1757_s1 = sand.u32 1, %s1378_s29   ;;  %s1227_s8 = scalar_lea.vmem %s326_s22, 128 }
  0x40   : > { %s314_s27 = scalar_lea.sflag [#allocation6], %s1757_s1  ;;  %p1228_p2 = scmp.ne.s32.totalorder %s326_s22, %s1227_s8 }
  0x41   : > { %s1396_s16 = smov [#allocation5]  }
  0x42   : > { %p1230_p6 = pnand %p1228_p2, %p1188_p7  ;;  %s1232_s12 = sshll.u32 %s1396_s16, 4  ;;  %s1233_s12 = int_to_ptr.vmem [resolvable:$false] %s1232_s12 }
  0x43   : > { %s1234_s4 = scalar_lea.vmem %s1233_s12, 256  ;;  %p1235_p12 = scmp.lt.s32.totalorder %s326_s22, %s1233_s12 }
  0x44   : > { %p1231_p9 = pneg %p1230_p6  ;;  %p1236_p13 = scmp.lt.s32.totalorder %s1234_s4, %s1227_s8 }
  0x46   : > { %p1237_p3 = por %p1236_p13, %p1235_p12 }
  0x48   : > { %p1238_p5 = pnand %p1237_p3, %p1231_p9 }
  0x4a   : > { %1241 = shalt.err (!%p1238_p5)
}
  0x4b   : > { %1077 = dma.hbm_to_vmem [thread:$0]  (!%p1546_p11), %s323_s9, 128, %s326_s22, %s314_s27  }
  0x4c   : > { %s355_s1 = scalar_lea.vmem [#allocation10], %s1538_s17  ;;  %s380_s20 = scalar_lea.hbm %s1727_s3, %s1541_s18 }
  0x4d   : > { %s363_s23 = sshll.u32 %s355_s1, 4  ;;  %s1397_s8 = smov [#allocation10]   ;;  %s364_s23 = int_to_ptr.vmem [resolvable:$true] %s363_s23 }
  0x4e   : > { %s1255_s16 = scalar_lea.vmem %s364_s23, 128  ;;  %s1260_s12 = sshll.u32 %s1397_s8, 4  ;;  %s1261_s12 = int_to_ptr.vmem [resolvable:$false] %s1260_s12 }
  0x4f   : > { %p1256_p2 = scmp.ne.s32.totalorder %s364_s23, %s1255_s16  ;;  %s1262_s4 = scalar_lea.vmem %s1261_s12, 256 }
  0x50   : > { %p1263_p12 = scmp.lt.s32.totalorder %s364_s23, %s1261_s12  ;;  %p1264_p13 = scmp.lt.s32.totalorder %s1262_s4, %s1255_s16 }
  0x51   : > { %p1258_p6 = pnand %p1256_p2, %p1188_p7 }
  0x52   : > { %p1265_p3 = por %p1264_p13, %p1263_p12 }
  0x53   : > { %p1259_p9 = pneg %p1258_p6 }
  0x55   : > { %p1266_p5 = pnand %p1265_p3, %p1259_p9 }
  0x57   : > { %1269 = shalt.err (!%p1266_p5)
}
  0x58   : > { %1083 = dma.hbm_to_vmem [thread:$0]  (!%p1546_p11), %s361_s25, 128, %s364_s23, %s1558_s19  }
  0x59   : > { %s374_s9 = scalar_lea.vmem [#allocation11], %s1538_s17  ;;  %s1758_s24 = sand.u32 1, %s1390_s10  }
  0x5a   : > { %s382_s1 = sshll.u32 %s374_s9, 4  ;;  %s371_s14 = scalar_lea.sflag [#allocation12], %s1758_s24  ;;  %s383_s1 = int_to_ptr.vmem [resolvable:$true] %s382_s1 }
  0x5b   : > { %s1283_s16 = scalar_lea.vmem %s383_s1, 128  ;;  %s1398_s8 = smov [#allocation11]  }
  0x5c   : > { %p1284_p2 = scmp.ne.s32.totalorder %s383_s1, %s1283_s16  ;;  %s1288_s12 = sshll.u32 %s1398_s8, 4  ;;  %s1289_s12 = int_to_ptr.vmem [resolvable:$false] %s1288_s12 }
  0x5d   : > { %s1290_s4 = scalar_lea.vmem %s1289_s12, 256  ;;  %p1291_p12 = scmp.lt.s32.totalorder %s383_s1, %s1289_s12 }
  0x5e   : > { %p1286_p6 = pnand %p1284_p2, %p1188_p7  ;;  %p1292_p13 = scmp.lt.s32.totalorder %s1290_s4, %s1283_s16 }
  0x60   : > { %p1287_p9 = pneg %p1286_p6  ;;  %p1293_p3 = por %p1292_p13, %p1291_p12 }
  0x62   : > { %p1294_p5 = pnand %p1293_p3, %p1287_p9 }
  0x64   : > { %1297 = shalt.err (!%p1294_p5)
}
  0x65   : > { %1086 = dma.hbm_to_vmem [thread:$0]  (!%p1546_p11), %s380_s20, 128, %s383_s1, %s371_s14  }
  0x66   : > { %391 = sbr.rel (%p1499_p8) target bundleno = 1404 (0x57c), region = 52  ;;  %s1616_s25 = sand.u32 (!%p1499_p8), 1, %s1374_s28  }
  0x67   : > { %s1619_s23 = sshll.u32 (!%p1499_p8), %s1616_s25, 3  ;;  %s394_s27 = scalar_lea.sflag (!%p1499_p8), [#allocation6], %s1616_s25 }
  0x68   : > { %s397_s21 = scalar_lea.vmem (!%p1499_p8), [#allocation5], %s1619_s23 }
  0x6b   : > { %1349 = dma.done.wait (%p1489_p4), %s394_s27, 128  }
  0x6c   : > { %1351 = vsyncadd (%p1489_p4), %s394_s27, 4294967168  ;;  %s402_s15 = sand.u32 1, %s1480_s11   ;;  %s406_s20 = scalar_lea.vmem [#allocation8], %s1619_s23 }
  0x6d   : > { %s403_s18 = scalar_lea.sflag [#allocation9], %s402_s15 }
  0x6e   : > { %1353 = dma.done.wait (%p1489_p4), %s403_s18, 256  }
  0x6f   : > { %1355 = vsyncadd (%p1489_p4), %s403_s18, 4294967040  ;;  %s415_s22 = scalar_lea.vmem [#allocation10], %s1619_s23  ;;  %s421_s9 = scalar_lea.sflag [#allocation12], %s402_s15 }
  0x70   : > { %s424_s1 = scalar_lea.vmem [#allocation11], %s1619_s23 }
  0x71   : > { %1357 = dma.done.wait (%p1489_p4), %s421_s9, 128  }
  0x72   : > { %1359 = vsyncadd (%p1489_p4), %s421_s9, 4294967168 }
  0x73   : > { %1361 = dma.done.wait (%p72_p1), [#allocation12], 1024  }
  0x74   : > { %1363 = vsyncadd (%p72_p1), [#allocation12], 4294966272  ;;  %vm483_vm0 = vcmask 523264   ;;  %v1399_v0 = vmov 0.0   ;;  %vm1400_vm1 = vmmov 0   ;;  %v486_v1 = vld [vmem:[%s415_s22] sm:$0xff]  ;;  %v779_v49 = vlaneseq }
  0x75   : > { %1027 = vmatprep.subr.mxu0 %v1399_v0  ;;  %484 = vst.msk [vmem:[#allocation4] sm:$0xff] %vm483_vm0, %v1399_v0  ;;  %1029 = vmatprep.mubr.msk.f32.mxu0 %vm1400_vm1, %v1399_v0  ;;  %v485_v2 = vld [vmem:[%s406_s20] sm:$0xff]  ;;  %vm480_vm2 = vcmask 7168   ;;  %v1401_v3 = vmov -inf   ;;  %vm566_vm3 = vcmask 64512   ;;  %v1402_v7 = vmov 0  }
  0x76   : > { %1037 = vmatprep.subr.mxu1 %v1399_v0  ;;  %1053 = vmatprep.mubr.msk.f32.mxu1 %vm1400_vm1, %v1399_v0  ;;  %481 = vst.msk [vmem:[#allocation2] sm:$0xff] %vm480_vm2, %v1401_v3  ;;  %482 = vst.msk [vmem:[#allocation3] sm:$0xff] %vm480_vm2, %v1399_v0  ;;  %v487_v12 = vld [vmem:[%s424_s1] sm:$0xff]  ;;  %v690_v22 = vld [vmem:[#allocation13 + $0x28] sm:$0xff]  ;;  %v780_v51 = vand.u32 127, %v779_v49  ;;  %s1011_s12 = sshll.u32 %s1382_s30, 7 }
  0x77   : > { %1028 = vmatpush3.xpose.msk.msra.mxu0 %vm483_vm0, %v486_v1  ;;  %1150 = vset.pattern.permute.xlu0 %v1402_v7  ;;  %v692_v20 = vld [vmem:[#allocation13 + $0x38] sm:$0xff]  ;;  %v691_v21 = vld [vmem:[#allocation13 + $0x30] sm:$0xff]  ;;  %v689_v23 = vld [vmem:[#allocation13 + $0x20] sm:$0xff]  ;;  %s475_s4 = scalar_lea.vmem [#allocation14], %s1619_s23  ;;  %s808_s18 = scalar_lea.sflag [#allocation7], %s1616_s25 }
  0x78   : > { %1032 = vmatprep.subr.mxu0 %v1399_v0  ;;  %1151 = vset.pattern.permute.xlu1 %v1402_v7  ;;  %v688_v24 = vld [vmem:[#allocation13 + $0x18] sm:$0xff]  ;;  %v687_v25 = vld [vmem:[#allocation13 + $0x10] sm:$0xff]  ;;  %v686_v26 = vld [vmem:[#allocation13 + $0x8] sm:$0xff]  ;;  %vm781_vm4 = vcmp.lt.s32.totalorder %v780_v51, 32  ;;  %s822_s19 = sshll.u32 %s475_s4, 4  ;;  %s1403_s22 = smov [#allocation14]   ;;  %s823_s19 = int_to_ptr.vmem [resolvable:$true] %s822_s19 }
  0x79   : > { %1038 = vmatpush3.msra.mxu1 %v692_v20  ;;  %v685_v32 = vld [vmem:[#allocation13] sm:$0xff]  ;;  %v1006_v43 = vld [vmem:[%s1729_s5] ss:$0 sm:$0xff]  ;;  %s1298_s20 = scalar_lea.vmem %s823_s19, 128  ;;  %s1302_s9 = sshll.u32 %s1403_s22, 4  ;;  %s1303_s9 = int_to_ptr.vmem [resolvable:$false] %s1302_s9 }
  0x7a   : > { %1030 = vmatmul.mubr.msk.f32.vlgmr.msra.gmra.mxu0 %vm483_vm0, %v485_v2  ;;  %1039 = vmatprep.subr.mxu1 %v1399_v0  ;;  %v773_v45 = vld [vmem:[%s397_s21] sm:$0xff]  ;;  %s1759_s21 = sld [smem:[#allocation27_spill]]  ;;  %p1299_p1 = scmp.ne.s32.totalorder %s823_s19, %s1298_s20 }
  0x7b   : > { %1034 = vmatprep.mubr.msk.f32.mxu0 %vm1400_vm1, %v1399_v0  ;;  %1033 = vmatpush3.msra.mxu0 %v487_v12  ;;  %v1008_v60 = vld [vmem:[%s1730_s6] ss:$0 sm:$0xff]  ;;  %s1304_s30 = scalar_lea.vmem %s1303_s9, 256  ;;  %p1305_p11 = scmp.lt.s32.totalorder %s823_s19, %s1303_s9 }
  0x7c   : > { %1040 = vmatpush3.msra.mxu1 %v691_v21  ;;  %v590_v34 = vld [vmem:[#allocation4] sm:$0xff]  ;;  %v1009_v62 = vld [vmem:[%s1731_s7] ss:$0 sm:$0xff]  ;;  %p1300_p4 = pnand %p1299_p1, %p1528_p0  ;;  %p1306_p7 = scmp.lt.s32.totalorder %s1304_s30, %s1298_s20 }
  0x7d   : > { %v565_v8 = vld [vmem:[#allocation2] sm:$0xff]  ;;  %1041 = vmatprep.subr.mxu1 %v1399_v0  ;;  %v582_v27 = vld [vmem:[#allocation3] sm:$0xff] }
  0x7e   : > { %1042 = vmatpush3.msra.mxu1 %v690_v22  ;;  %p1301_p8 = pneg %p1300_p4  ;;  %p1307_p2 = por %p1306_p7, %p1305_p11 }
  0x7f   : > { %1043 = vmatprep.subr.mxu1 %v1399_v0 }
  0x80   : > { %1044 = vmatpush3.msra.mxu1 %v689_v23  ;;  %s820_s15 = scalar_lea.hbm %s1759_s21, %s1011_s12  ;;  %p1308_p6 = pnand %p1307_p2, %p1301_p8 }
  0x81   : > { %1045 = vmatprep.subr.mxu1 %v1399_v0 }
  0x82   : > { %1046 = vmatpush3.msra.mxu1 %v688_v24 }
  0x83   : > { %1047 = vmatprep.subr.mxu1 %v1399_v0 }
  0x84   : > { %1048 = vmatpush3.msra.mxu1 %v687_v25 }
  0x85   : > { %1049 = vmatprep.subr.mxu1 %v1399_v0 }
  0x86   : > { %1050 = vmatpush3.msra.mxu1 %v686_v26 }
  0x87   : > { %1051 = vmatprep.subr.mxu1 %v1399_v0 }
  0x88   : > { %1052 = vmatpush3.msra.mxu1 %v685_v32 }
 0x13a   : > { %v561_v4 = vpop.f32.mrf.mxu0 }
 0x13b   : > { %v567_v5 = vsel %vm566_vm3, %v561_v4, -inf }
 0x13c   : > { %568 = vmax.xlane.f32.xlu0 %v567_v5  ;;  %v1031_v6 = vpop.f32.mrf.mxu0 }
 0x1c5   : > { %v569_v9 = vpop.xlane.xlu0 %568 }
 0x1c6   : > { %v570_v10 = vmax.f32 %v565_v8, %v569_v9 }
 0x1c8   : > { %v571_v11 = vsub.f32 %v565_v8, %v570_v10  ;;  %672 = vst.msk [vmem:[#allocation2] sm:$0xff] %vm480_vm2, %v570_v10  ;;  %576 = vperm.xlu0 %1150, %v570_v10  }
 0x1ca   : > { %v572_v17 = vmul.f32 1.442695, %v571_v11 }
 0x243   : > { %v577_v13 = vpop.permute.xlu0 %576 }
 0x244   : > { %v579_v14 = vsub.f32 %v561_v4, %v577_v13 }
 0x246   : > { %v580_v15 = vmul.f32 1.442695, %v579_v14 }
 0x248   : > { %1152 = vpow2.f32 %v580_v15 }
 0x249   : > { %1154 = vpow2.f32 %v572_v17 }
 0x255   : > { %v1153_v16 = vpop.eup %1152 }
 0x256   : > { %1035 = vmatmul.mubr.msk.f32.vlgmr.msra.gmra.mxu0 %vm566_vm3, %v1153_v16  ;;  %v584_v18 = vsel %vm566_vm3, %v1153_v16, 0.0  ;;  %v1155_v19 = vpop.eup %1154 }
 0x257   : > { %585 = vadd.xlane.f32.xlu1 %v584_v18  ;;  %v583_v28 = vmul.f32 %v1155_v19, %v582_v27 }
 0x268   : > { %593 = vperm.xlu1 %1151, %v1155_v19  }
 0x2e0   : > { %v586_v29 = vpop.xlane.xlu1 %585 }
 0x2e1   : > { %v587_v30 = vadd.f32 %v586_v29, %v583_v28 }
 0x2e3   : > { %589 = vst.msk [vmem:[#allocation3] sm:$0xff] %vm480_vm2, %v587_v30 }
 0x2e4   : > { %v594_v35 = vpop.permute.xlu1 %593 }
 0x2e5   : > { %v596_v36 = vmul.f32 %v594_v35, %v590_v34 }
 0x2ea   : > { %v676_v31 = vld [vmem:[#allocation3] sm:$0xff] }
 0x2eb   : > { %1156 = vrcp.f32 %v676_v31 }
 0x2f8   : > { %v1157_v33 = vpop.eup %1156 }
 0x2f9   : > { %681 = vperm.xlu1 %1151, %v1157_v33  }
 0x316   : > { %v666_v37 = vpop.f32.mrf.mxu0 }
 0x317   : > { %v670_v38 = vadd.f32 %v666_v37, %v596_v36 }
 0x318   : > { %v1036_v39 = vpop.f32.mrf.mxu0 }
 0x319   : > { %671 = vst.msk [vmem:[#allocation4] sm:$0xff] %vm483_vm0, %v670_v38 }
 0x320   : > { %v678_v40 = vld [vmem:[#allocation4] sm:$0xff] }
 0x374   : > { %v682_v41 = vpop.permute.xlu1 %681 }
 0x375   : > { %v684_v42 = vmul.f32 %v682_v41, %v678_v40 }
 0x377   : > { %1054 = vmatmul.mubr.msk.f32.vlgmr.msra.gmra.mxu1 %vm483_vm0, %v684_v42 }
 0x437   : > { %v769_v44 = vpop.f32.mrf.mxu1 }
 0x438   : > { %v770_v46 = vadd.f32 %v1006_v43, %v769_v44 }
 0x439   : > { %v1055_v47 = vpop.f32.mrf.mxu1 }
 0x43a   : > { %v774_v48 = vadd.f32 %v773_v45, %v770_v46 }
 0x43c   : > { %775 = vadd.xlane.f32.xlu1 %v774_v48 }
 0x4c5   : > { %v776_v50 = vpop.xlane.xlu1 %775 }
 0x4c6   : > { %v777_v52 = vmul.f32 0.03125, %v776_v50 }
 0x4c8   : > { %v778_v53 = vsub.f32 %v774_v48, %v777_v52 }
 0x4ca   : > { %v782_v54 = vmul.f32 %v778_v53, %v778_v53 }
 0x4cc   : > { %v783_v55 = vsel %vm781_vm4, %v782_v54, 0.0 }
 0x4cd   : > { %784 = vadd.xlane.f32.xlu0 %v783_v55 }
 0x556   : > { %v785_v56 = vpop.xlane.xlu0 %784 }
 0x557   : > { %v786_v57 = vmul.f32 0.03125, %v785_v56 }
 0x559   : > { %v787_v58 = vadd.f32 1e-05, %v786_v57 }
 0x55b   : > { %1158 = vrsqrt.f32 %v787_v58 }
 0x568   : > { %v1159_v59 = vpop.eup %1158 }
 0x569   : > { %v789_v61 = vmul.f32 %v1159_v59, %v778_v53 }
 0x56b   : > { %v797_v63 = vmul.f32 %v1008_v60, %v789_v61 }
 0x56d   : > { %v805_v0 = vadd.f32 %v1009_v62, %v797_v63 }
 0x56f   : > { %806 = vst [vmem:[%s475_s4] sm:$0xff] %v805_v0 }
 0x570   : > { %1311 = shalt.err (!%p1308_p6)
}
 0x571   : > { %s1312_s23 = scalar_lea.hbm %s820_s15, 128  ;;  %s1316_s11 = scalar_lea.hbm %s1759_s21, 256 }
 0x572   : > { %p1313_p9 = scmp.ne.s32.totalorder %s820_s15, %s1312_s23  ;;  %p1317_p3 = scmp.lt.s32.totalorder %s820_s15, %s1759_s21 }
 0x573   : > { %p1318_p5 = scmp.lt.s32.totalorder %s1316_s11, %s1312_s23 }
 0x574   : > { %p1314_p12 = pnand %p1313_p9, %p1528_p0 }
 0x575   : > { %p1319_p1 = por %p1318_p5, %p1317_p3 }
 0x576   : > { %p1315_p13 = pneg %p1314_p12 }
 0x578   : > { %p1320_p4 = pnand %p1319_p1, %p1315_p13 }
 0x57a   : > { %1323 = shalt.err (!%p1320_p4)
}
 0x57b   : > { %1068 = dma.vmem_to_hbm [thread:$0]  (%p1528_p0), %s823_s19, 128, %s820_s15, %s808_s18  }
 0x57c PF: > { %s1760_s14 = sld [smem:[#allocation20_spill]] }
 0x57d   : > { %s1761_s16 = sld [smem:[#allocation22_spill]] }
 0x582   : > { %s834_s8 = sand.u32 1, %s1760_s14  }
 0x583   : > { %p1762_p8 = scmp.ne.s32.totalorder %s1761_s16, 0  ;;  %s835_s12 = scalar_lea.sflag [#allocation7], %s834_s8 }
 0x585   : > { %p1088_p11 = pnand %p987_p10, %p1762_p8 }
 0x587   : > { %p1089_p7 = pneg %p1088_p11 }
 0x589   : > { %1365 = dma.done.wait (%p1089_p7), %s835_s12, 128  }
 0x58a   : > { %1367 = vsyncadd (%p1089_p7), %s835_s12, 4294967168  ;;  %s30_s10 = sadd.s32 1, %s1390_s10   ;;  %s1763_s4 = sld [smem:[#allocation24_spill]] }
 0x58b   : > { %p27_p2 = scmp.ge.s32.totalorder %s30_s10, 4   ;;  %s1764_s30 = sld [smem:[#allocation21_spill]] }
 0x58c   : > { %s1765_s9 = sld [smem:[#allocation23_spill]]  ;;  %s1766_s27 = smov %s1374_s28 }
 0x58d   : > { %s1767_s28 = smov %s1378_s29  ;;  %29 = sbr.rel (!%p27_p2) target bundleno = 14 (0xe), region = 146 }
 0x590   : > { %s1768_s29 = smov %s1763_s4 }
 0x592   :  { %840 = vsyncpa [#allocation6], 1 }
 0x593   :  { %842 = vsyncpa [#allocation6 + $0x1], 1 }
 0x594   :  { %843 = vsyncpa [#allocation9], 1 }
 0x595   :  { %845 = vsyncpa [#allocation9 + $0x1], 1 }
 0x596   :  { %846 = vsyncpa [#allocation12], 1 }
 0x597   :  { %848 = vsyncpa [#allocation12 + $0x1], 1 }
 0x598   :  { %849 = vsyncpa [#allocation7], 1 }
 0x599   :  { %851 = vsyncpa [#allocation7 + $0x1], 1 }

</bundles_post_ra>
